<compile_context>
chip_gen: v6e
topology: v6e:2x2x1
jax: 0.10.0
libtpu: 0.0.40
codegen_flags: <defaults>
</compile_context>

<pallas_src>
import jax
import jax.numpy as jnp
from jax.experimental import pallas as pl
from jax.experimental.pallas import tpu as pltpu


def attention_kernel(enc_ref, dec_ref, wet_ref, wdt_ref, bias_ref, wf_ref,
                     bf_ref, ctx_ref, alpha_ref):
    # enc_ref: (Bb, N, E) bf16   dec_ref: (Bb, D) bf16
    # wet_ref: (E, A) bf16       wdt_ref: (D, A) bf16
    # bias_ref: (1, A) f32 (= be + bd)   wf_ref: (1, A) f32   bf_ref: (1,1) f32 SMEM
    Bb, N, E = enc_ref.shape
    A = wet_ref.shape[1]

    enc = enc_ref[...]                                   # (Bb, N, E) bf16
    dec = dec_ref[...]                                   # (Bb, D)    bf16

    # encoder_att: one dense (Bb*N, E) @ (E, A) GEMM on the MXU, f32 accumulate.
    att1 = jnp.dot(enc.reshape(Bb * N, E), wet_ref[...],
                   preferred_element_type=jnp.float32).reshape(Bb, N, A)

    # decoder_att batched over the block: (Bb, D) @ (D, A) -> (Bb, A).
    att2 = jnp.dot(dec, wdt_ref[...], preferred_element_type=jnp.float32)

    # relu(att1 + att2.unsqueeze(1) + (be + bd))  -- f32 VPU math.
    h = jnp.maximum(att1 + att2[:, None, :] + bias_ref[...][None, :, :], 0.0)

    # full_att(...).squeeze(2): lane-dense scores (Bb, N) via VPU mul + lane reduce.
    att = jnp.sum(h * wf_ref[...][None, :, :], axis=-1) + bf_ref[0, 0]

    # softmax over the pixel axis (last axis here -> lane axis).
    m = jnp.max(att, axis=-1, keepdims=True)
    e = jnp.exp(att - m)
    denom = jnp.sum(e, axis=-1, keepdims=True)
    alpha = e * pl.reciprocal(denom, approx=True)        # (Bb, N) f32, EUP divide

    alpha_ref[...] = alpha

    # context = sum_n alpha_n * enc_n : batched (1, N) @ (N, E) on the MXU,
    # stored as a multi-sublane (Bb, E) tile.
    ctx = jnp.einsum('bqn,bne->bqe',
                     alpha[:, None, :].astype(enc.dtype), enc,
                     preferred_element_type=jnp.float32)
    ctx_ref[...] = ctx[:, 0, :]


def attention_forward(encoder_out, decoder_hidden, params, *, block_b=None):
    """encoder_out: (B, N, E) f32; decoder_hidden: (B, D) f32."""
    B, N, E = encoder_out.shape
    D = decoder_hidden.shape[1]
    We, be, Wd, bd, Wf, bf = (params["We"], params["be"], params["Wd"],
                              params["bd"], params["Wf"], params["bf"])
    A = We.shape[0]

    # Batch tiling: B rows per grid step when B is small, otherwise 16-row
    # blocks (multiple of 8 sublanes).  For v7x (64 MiB VMEM) use a smaller
    # block_b / set vmem_limit_bytes when E, N, A are production-sized.
    if block_b is None:
        block_b = min(B, 16)
    n_blocks = pl.cdiv(B, block_b)
    B_pad = n_blocks * block_b
    if B_pad != B:
        encoder_out = jnp.pad(encoder_out, ((0, B_pad - B), (0, 0), (0, 0)))
        decoder_hidden = jnp.pad(decoder_hidden, ((0, B_pad - B), (0, 0)))

    # One-time layout plumbing in the wrapper (free): pre-transposed bf16
    # weights for the MXU, fused encoder+decoder bias row, scalar final bias.
    enc_bf = encoder_out.astype(jnp.bfloat16)
    dec_bf = decoder_hidden.astype(jnp.bfloat16)
    WeT = We.T.astype(jnp.bfloat16)                       # (E, A)
    WdT = Wd.T.astype(jnp.bfloat16)                       # (D, A)
    bias_row = (be + bd).reshape(1, A).astype(jnp.float32)
    wf_row = Wf.reshape(1, A).astype(jnp.float32)
    bf_scalar = bf.reshape(1, 1).astype(jnp.float32)

    ctx, alpha = pl.pallas_call(
        attention_kernel,
        out_shape=(
            jax.ShapeDtypeStruct((B_pad, E), jnp.float32),
            jax.ShapeDtypeStruct((B_pad, N), jnp.float32),
        ),
        grid_spec=pltpu.PrefetchScalarGridSpec(
            num_scalar_prefetch=0,
            grid=(n_blocks,),
            in_specs=[
                pl.BlockSpec((block_b, N, E), lambda i: (i, 0, 0)),  # encoder slab
                pl.BlockSpec((block_b, D), lambda i: (i, 0)),        # decoder slab
                pl.BlockSpec((E, A), lambda i: (0, 0)),              # We^T
                pl.BlockSpec((D, A), lambda i: (0, 0)),              # Wd^T
                pl.BlockSpec((1, A), lambda i: (0, 0)),              # be + bd
                pl.BlockSpec((1, A), lambda i: (0, 0)),              # Wf row
                pl.BlockSpec(memory_space=pltpu.MemorySpace.SMEM),   # bf scalar
            ],
            out_specs=[
                pl.BlockSpec((block_b, E), lambda i: (i, 0)),        # context
                pl.BlockSpec((block_b, N), lambda i: (i, 0)),        # alpha
            ],
        ),
        compiler_params=pltpu.CompilerParams(
            dimension_semantics=("parallel",)),
    )(enc_bf, dec_bf, WeT, WdT, bias_row, wf_row, bf_scalar)

    return ctx[:B], alpha[:B]


def attention_reference(encoder_out, decoder_hidden, params):
    """Plain-JAX f32 reference mirroring the PyTorch forward."""
    We, be, Wd, bd, Wf, bf = (params["We"], params["be"], params["Wd"],
                              params["bd"], params["Wf"], params["bf"])
    att1 = encoder_out @ We.T + be                            # (B, N, A)
    att2 = (decoder_hidden @ Wd.T + bd)[:, None, :]           # (B, 1, A)
    att = (jnp.maximum(att1 + att2, 0.0) @ Wf.T + bf)[..., 0]  # (B, N)
    alpha = jax.nn.softmax(att, axis=1)
    context = jnp.sum(encoder_out * alpha[..., None], axis=1)
    return context, alpha


if __name__ == "__main__":
    B, N = 2, 8                 # batch, number of encoder "pixels"
    encoder_dim, decoder_dim, attention_dim = 32, 32, 32

    key = jax.random.PRNGKey(0)
    ks = jax.random.split(key, 8)

    # nn.Linear shapes: weight (out, in), bias (out,)
    params = {
        "We": jax.random.normal(ks[0], (attention_dim, encoder_dim), jnp.float32) * 0.1,
        "be": jax.random.normal(ks[1], (attention_dim,), jnp.float32) * 0.1,
        "Wd": jax.random.normal(ks[2], (attention_dim, decoder_dim), jnp.float32) * 0.1,
        "bd": jax.random.normal(ks[3], (attention_dim,), jnp.float32) * 0.1,
        "Wf": jax.random.normal(ks[4], (1, attention_dim), jnp.float32) * 0.1,
        "bf": jax.random.normal(ks[5], (1,), jnp.float32) * 0.1,
    }

    encoder_out = jax.random.normal(ks[6], (B, N, encoder_dim), jnp.float32)
    decoder_hidden = jax.random.normal(ks[7], (B, decoder_dim), jnp.float32)

    ctx, alpha = attention_forward(encoder_out, decoder_hidden, params)
    jax.block_until_ready((ctx, alpha))

    ctx_ref, alpha_ref = attention_reference(encoder_out, decoder_hidden, params)
    # bf16 MXU operands + approx reciprocal -> relaxed tolerance vs f32 reference.
    assert jnp.allclose(ctx, ctx_ref, atol=2e-2, rtol=2e-2)
    assert jnp.allclose(alpha, alpha_ref, atol=2e-2, rtol=2e-2)

    print("KERNEL_OK")
</pallas_src>

<mosaic_0001>
module attributes {stable_mosaic.version = 11 : i64} {
  func.func @attention_kernel(%arg0: i32, %arg1: memref<2x8x32xbf16, #tpu.memory_space<vmem>>, %arg2: memref<2x32xbf16, #tpu.memory_space<vmem>>, %arg3: memref<32x32xbf16, #tpu.memory_space<vmem>>, %arg4: memref<32x32xbf16, #tpu.memory_space<vmem>>, %arg5: memref<1x32xf32, #tpu.memory_space<vmem>>, %arg6: memref<1x32xf32, #tpu.memory_space<vmem>>, %arg7: memref<1x1xf32, #tpu.memory_space<smem>>, %arg8: memref<2x32xf32, #tpu.memory_space<vmem>>, %arg9: memref<2x8xf32, #tpu.memory_space<vmem>>) attributes {dimension_semantics = [#tpu.dimension_semantics<parallel>], iteration_bounds = array<i64: 1>, scalar_prefetch = 0 : i64, scratch_operands = 0 : i64, tpu.core_type = #tpu.core_type<tc>, window_params = [{transform_indices = @transform_0, window_bounds = array<i64: 2, 8, 32>}, {transform_indices = @transform_1, window_bounds = array<i64: 2, 32>}, {pipeline_mode = #tpu.pipeline_mode<synchronous>, transform_indices = @transform_2, window_bounds = array<i64: 32, 32>}, {pipeline_mode = #tpu.pipeline_mode<synchronous>, transform_indices = @transform_3, window_bounds = array<i64: 32, 32>}, {pipeline_mode = #tpu.pipeline_mode<synchronous>, transform_indices = @transform_4, window_bounds = array<i64: 1, 32>}, {pipeline_mode = #tpu.pipeline_mode<synchronous>, transform_indices = @transform_5, window_bounds = array<i64: 1, 32>}, {transform_indices = @transform_6, window_bounds = array<i64: 1, 1>}, {transform_indices = @transform_7, window_bounds = array<i64: 2, 32>}, {transform_indices = @transform_8, window_bounds = array<i64: 2, 8>}]} {
    %c0 = arith.constant 0 : index
    %c0_0 = arith.constant 0 : index
    %c0_1 = arith.constant 0 : index
    %0 = vector.load %arg1[%c0, %c0_0, %c0_1] : memref<2x8x32xbf16, #tpu.memory_space<vmem>>, vector<2x8x32xbf16>
    %c0_2 = arith.constant 0 : index
    %c0_3 = arith.constant 0 : index
    %1 = vector.load %arg2[%c0_2, %c0_3] : memref<2x32xbf16, #tpu.memory_space<vmem>>, vector<2x32xbf16>
    %2 = vector.shape_cast %0 : vector<2x8x32xbf16> to vector<16x32xbf16>
    %c0_4 = arith.constant 0 : index
    %c0_5 = arith.constant 0 : index
    %3 = vector.load %arg3[%c0_4, %c0_5] : memref<32x32xbf16, #tpu.memory_space<vmem>>, vector<32x32xbf16>
    %cst = arith.constant dense<0.000000e+00> : vector<16x32xf32>
    %4 = tpu.matmul %2, %3, %cst {dimension_numbers = #tpu.dot_dimension_numbers<[1], [0], [0], [1], [0, 0, 1, 1], [], []>} : vector<16x32xbf16>, vector<32x32xbf16>, vector<16x32xf32> -> vector<16x32xf32>
    %5 = vector.shape_cast %4 : vector<16x32xf32> to vector<2x8x32xf32>
    %c0_6 = arith.constant 0 : index
    %c0_7 = arith.constant 0 : index
    %6 = vector.load %arg4[%c0_6, %c0_7] : memref<32x32xbf16, #tpu.memory_space<vmem>>, vector<32x32xbf16>
    %cst_8 = arith.constant dense<0.000000e+00> : vector<2x32xf32>
    %7 = tpu.matmul %1, %6, %cst_8 {dimension_numbers = #tpu.dot_dimension_numbers<[1], [0], [0], [1], [0, 0, 1, 1], [], []>} : vector<2x32xbf16>, vector<32x32xbf16>, vector<2x32xf32> -> vector<2x32xf32>
    %8 = vector.shape_cast %7 : vector<2x32xf32> to vector<2x1x32xf32>
    %9 = vector.broadcast %8 : vector<2x1x32xf32> to vector<2x8x32xf32>
    %10 = arith.addf %5, %9 : vector<2x8x32xf32>
    %c0_9 = arith.constant 0 : index
    %c0_10 = arith.constant 0 : index
    %11 = vector.load %arg5[%c0_9, %c0_10] : memref<1x32xf32, #tpu.memory_space<vmem>>, vector<1x32xf32>
    %12 = vector.shape_cast %11 : vector<1x32xf32> to vector<1x1x32xf32>
    %13 = vector.broadcast %12 : vector<1x1x32xf32> to vector<2x8x32xf32>
    %14 = arith.addf %10, %13 : vector<2x8x32xf32>
    %cst_11 = arith.constant 0.000000e+00 : f32
    %15 = vector.broadcast %cst_11 : f32 to vector<2x8x32xf32>
    %16 = arith.maximumf %14, %15 : vector<2x8x32xf32>
    %c0_12 = arith.constant 0 : index
    %c0_13 = arith.constant 0 : index
    %17 = vector.load %arg6[%c0_12, %c0_13] : memref<1x32xf32, #tpu.memory_space<vmem>>, vector<1x32xf32>
    %18 = vector.shape_cast %17 : vector<1x32xf32> to vector<1x1x32xf32>
    %19 = vector.broadcast %18 : vector<1x1x32xf32> to vector<2x8x32xf32>
    %20 = arith.mulf %16, %19 : vector<2x8x32xf32>
    %cst_14 = arith.constant dense<0.000000e+00> : vector<2x8xf32>
    %21 = vector.multi_reduction <add>, %20, %cst_14 [2] : vector<2x8x32xf32> to vector<2x8xf32>
    %c0_15 = arith.constant 0 : index
    %c0_16 = arith.constant 0 : index
    %22 = memref.load %arg7[%c0_15, %c0_16] : memref<1x1xf32, #tpu.memory_space<smem>>
    %23 = vector.broadcast %22 : f32 to vector<2x8xf32>
    %24 = arith.addf %21, %23 : vector<2x8xf32>
    %cst_17 = arith.constant dense<0xFF800000> : vector<2xf32>
    %25 = vector.multi_reduction <maximumf>, %24, %cst_17 [1] : vector<2x8xf32> to vector<2xf32>
    %26 = vector.shape_cast %25 : vector<2xf32> to vector<2x1xf32>
    %27 = vector.broadcast %26 : vector<2x1xf32> to vector<2x8xf32>
    %28 = arith.subf %24, %27 : vector<2x8xf32>
    %29 = math.exp %28 : vector<2x8xf32>
    %cst_18 = arith.constant dense<0.000000e+00> : vector<2xf32>
    %30 = vector.multi_reduction <add>, %29, %cst_18 [1] : vector<2x8xf32> to vector<2xf32>
    %31 = vector.shape_cast %30 : vector<2xf32> to vector<2x1xf32>
    %32 = tpu.reciprocal %31 {approx = true} : vector<2x1xf32> -> vector<2x1xf32>
    %33 = vector.broadcast %32 : vector<2x1xf32> to vector<2x8xf32>
    %34 = arith.mulf %29, %33 : vector<2x8xf32>
    %c0_19 = arith.constant 0 : index
    %c0_20 = arith.constant 0 : index
    %35 = vector.load %arg9[%c0_19, %c0_20] : memref<2x8xf32, #tpu.memory_space<vmem>>, vector<2x8xf32>
    tpu.vector_store %arg9[%c0_19, %c0_20], %34 {strides = array<i32>} : memref<2x8xf32, #tpu.memory_space<vmem>>, vector<2x8xf32>,
    %36 = vector.shape_cast %34 : vector<2x8xf32> to vector<2x1x8xf32>
    %37 = arith.truncf %36 : vector<2x1x8xf32> to vector<2x1x8xbf16>
    "tpu.trace_start"() <{level = 10 : i32, message = "bqn,bne->bqe"}> : () -> ()
    %cst_21 = arith.constant dense<0.000000e+00> : vector<2x1x32xf32>
    %38 = tpu.matmul %37, %0, %cst_21 {dimension_numbers = #tpu.dot_dimension_numbers<[2], [1], [1], [2], [0, 0, 0, 1, 1, 2], [0], [0]>} : vector<2x1x8xbf16>, vector<2x8x32xbf16>, vector<2x1x32xf32> -> vector<2x1x32xf32>
    "tpu.trace_stop"() : () -> ()
    %39 = vector.shape_cast %38 : vector<2x1x32xf32> to vector<2x32xf32>
    %c0_22 = arith.constant 0 : index
    %c0_23 = arith.constant 0 : index
    %40 = vector.load %arg8[%c0_22, %c0_23] : memref<2x32xf32, #tpu.memory_space<vmem>>, vector<2x32xf32>
    tpu.vector_store %arg8[%c0_22, %c0_23], %39 {strides = array<i32>} : memref<2x32xf32, #tpu.memory_space<vmem>>, vector<2x32xf32>,
    return
  }
  func.func @transform_0(%arg0: i32) -> (i32, i32, i32) {
    %c0_i32 = arith.constant 0 : i32
    %c0_i32_0 = arith.constant 0 : i32
    %c0_i32_1 = arith.constant 0 : i32
    return %arg0, %c0_i32, %c0_i32_0 : i32, i32, i32
  }
  func.func @transform_1(%arg0: i32) -> (i32, i32) {
    %c0_i32 = arith.constant 0 : i32
    %c0_i32_0 = arith.constant 0 : i32
    return %arg0, %c0_i32 : i32, i32
  }
  func.func @transform_2(%arg0: i32) -> (i32, i32) {
    %c0_i32 = arith.constant 0 : i32
    %c0_i32_0 = arith.constant 0 : i32
    %c0_i32_1 = arith.constant 0 : i32
    return %c0_i32, %c0_i32_0 : i32, i32
  }
  func.func @transform_3(%arg0: i32) -> (i32, i32) {
    %c0_i32 = arith.constant 0 : i32
    %c0_i32_0 = arith.constant 0 : i32
    %c0_i32_1 = arith.constant 0 : i32
    return %c0_i32, %c0_i32_0 : i32, i32
  }
  func.func @transform_4(%arg0: i32) -> (i32, i32) {
    %c0_i32 = arith.constant 0 : i32
    %c0_i32_0 = arith.constant 0 : i32
    %c0_i32_1 = arith.constant 0 : i32
    return %c0_i32, %c0_i32_0 : i32, i32
  }
  func.func @transform_5(%arg0: i32) -> (i32, i32) {
    %c0_i32 = arith.constant 0 : i32
    %c0_i32_0 = arith.constant 0 : i32
    %c0_i32_1 = arith.constant 0 : i32
    return %c0_i32, %c0_i32_0 : i32, i32
  }
  func.func @transform_6(%arg0: i32) -> (i32, i32) {
    %c0_i32 = arith.constant 0 : i32
    %c0_i32_0 = arith.constant 0 : i32
    %c0_i32_1 = arith.constant 0 : i32
    return %c0_i32, %c0_i32_0 : i32, i32
  }
  func.func @transform_7(%arg0: i32) -> (i32, i32) {
    %c0_i32 = arith.constant 0 : i32
    %c0_i32_0 = arith.constant 0 : i32
    return %arg0, %c0_i32 : i32, i32
  }
  func.func @transform_8(%arg0: i32) -> (i32, i32) {
    %c0_i32 = arith.constant 0 : i32
    %c0_i32_0 = arith.constant 0 : i32
    return %arg0, %c0_i32 : i32, i32
  }
}

</mosaic_0001>

<bundles_post_ra>
// kernel: tpu_custom_call.1
= control target key start
LH: loop header
LB: loop body
LE: loop exit
PB: predicated region body
PF: predicated region fallthrough
CT: control target
= control target key end

     0   :  { %15 = vsyncpa [#allocation4], 0  ;;  %s818_s0 = inlined_call_operand.hbm [shape: bf16[2,8,32], index: 0, kind: input, shape index: {}]   ;;  %s819_s1 = inlined_call_operand.vmem [shape: bf16[2,32], index: 1, kind: input, shape index: {}]   ;;  %s820_s2 = inlined_call_operand.hbm [shape: bf16[32,32], index: 2, kind: input, shape index: {}]   ;;  %s821_s3 = inlined_call_operand.hbm [shape: bf16[32,32], index: 3, kind: input, shape index: {}]   ;;  %s822_s4 = inlined_call_operand.vmem [shape: f32[1,32], index: 4, kind: input, shape index: {}]   ;;  %s823_s5 = inlined_call_operand.vmem [shape: f32[1,32], index: 5, kind: input, shape index: {}]   ;;  %s824_s6 = inlined_call_operand.<no memory space> [shape: f32[1,1], index: 6, kind: input, shape index: {}]   ;;  %s825_s7 = inlined_call_operand.hbm [shape: f32[2,32], index: 7, kind: output, shape index: {0}]   ;;  %s826_s8 = inlined_call_operand.hbm [shape: f32[2,8], index: 8, kind: output, shape index: {1}]  }
   0x1   :  { %16 = vsyncpa [#allocation7], 0 }
   0x2   :  { %17 = vsyncpa [#allocation5], 0 }
   0x3   :  { %18 = vsyncpa [#allocation11], 0  ;;  %s690_s27 = smov [#allocation6]   ;;  %s691_s29 = smov [#allocation3]  }
   0x4   :  { %s38_s28 = sshll.u32 %s690_s27, 4  ;;  %s24_s30 = sshll.u32 %s691_s29, 4  ;;  %s39_s28 = int_to_ptr.vmem [resolvable:$true] %s38_s28  ;;  %s25_s30 = int_to_ptr.vmem [resolvable:$true] %s24_s30 }
   0x5   :  { %s590_s9 = scalar_lea.vmem %s39_s28, 256  ;;  %p595_p1 = scmp.lt.s32.totalorder %s39_s28, %s39_s28 }
   0x6   :  { %p591_p0 = scmp.ne.s32.totalorder %s39_s28, %s590_s9  ;;  %p596_p2 = scmp.lt.s32.totalorder %s590_s9, %s590_s9 }
   0x8   :  { %p597_p3 = por %p596_p2, %p595_p1 }
   0xa   :  { %p598_p4 = pnand %p597_p3, %p591_p0 }
   0xc   :  { %601 = shalt.err (!%p598_p4)
}
   0xd   :  { %s692_s10 = smov 64   ;;  %s693_s11 = smov 4  }
   0xe   :  { %44 = dma.hbm_to_vmem [thread:$0]  %s820_s2, 256, %s39_s28, [#allocation7], %s692_s10, %s692_s10, %s693_s11  }
   0xf   :  { %s610_s14 = scalar_lea.vmem %s25_s30, 128  ;;  %p615_p6 = scmp.lt.s32.totalorder %s25_s30, %s25_s30 }
  0x10   :  { %p611_p5 = scmp.ne.s32.totalorder %s25_s30, %s610_s14  ;;  %p616_p7 = scmp.lt.s32.totalorder %s610_s14, %s610_s14 }
  0x12   :  { %p617_p8 = por %p616_p7, %p615_p6 }
  0x14   :  { %p618_p9 = pnand %p617_p8, %p611_p5 }
  0x16   :  { %621 = shalt.err (!%p618_p9)
}
  0x17   :  { %30 = dma.hbm_to_vmem [thread:$0]  %s818_s0, 128, %s25_s30, [#allocation4], %s692_s10, %s692_s10, %s693_s11  }
  0x18   :  { %s694_s17 = smov [#allocation8]  }
  0x19   :  { %s50_s18 = sshll.u32 %s694_s17, 4  ;;  %s51_s18 = int_to_ptr.vmem [resolvable:$true] %s50_s18 }
  0x1a   :  { %s630_s19 = scalar_lea.vmem %s51_s18, 256  ;;  %p635_p11 = scmp.lt.s32.totalorder %s51_s18, %s51_s18 }
  0x1b   :  { %p631_p10 = scmp.ne.s32.totalorder %s51_s18, %s630_s19  ;;  %p636_p12 = scmp.lt.s32.totalorder %s630_s19, %s630_s19 }
  0x1d   :  { %p637_p13 = por %p636_p12, %p635_p11 }
  0x1f   :  { %p638_p0 = pnand %p637_p13, %p631_p10 }
  0x21   :  { %641 = shalt.err (!%p638_p0)
}
  0x22   :  { %56 = dma.hbm_to_vmem [thread:$0]  %s821_s3, 256, %s51_s18, [#allocation7], %s692_s10, %s692_s10, %s693_s11  }
  0x23   :  { %682 = dma.done.wait [#allocation4], 128  }
  0x24   :  { %683 = vsyncadd [#allocation4], 4294967168 }
  0x25   :  { %684 = dma.done.wait [#allocation7], 512  }
  0x26   :  { %685 = vsyncadd [#allocation7], 4294966784  ;;  %v695_v0 = vmov 0.0   ;;  %vm696_vm0 = vmmov 0   ;;  %v571_v1 = vld [vmem:[#allocation6 + $0x8] sm:$0xff]   ;;  %v572_v2 = vld [vmem:[#allocation8 + $0x8] sm:$0xff]   ;;  %v205_v11 = vlaneseq  ;;  %v263_v43 = vstv %s824_s6 }
  0x27   :  { %530 = vmatprep.subr.bf16.mxu0 %v695_v0  ;;  %538 = vmatprep.subr.bf16.mxu1 %v695_v0  ;;  %v573_v3 = vld [vmem:[#allocation6] sm:$0xff]   ;;  %v574_v4 = vld [vmem:[#allocation8] sm:$0xff]   ;;  %v757_v5 = vld [vmem:[#allocation3] sm:$0xf]  ;;  %vm97_vm1 = vcmask 261120   ;;  %vm278_vm2 = vcmask 1041409  }
  0x28   :  { %534 = vmatprep.mubr.msk.bf16.mxu0 %vm696_vm0, %v695_v0  ;;  %542 = vmatprep.mubr.msk.bf16.mxu1 %vm696_vm0, %v695_v0  ;;  %v759_v6 = vld [vmem:[#allocation3 + $0x4] sm:$0xf]  ;;  %v75_v8 = vld [vmem:[%s819_s1] sm:$0x1]  ;;  %v697_v9 = vmov 1966171168  }
  0x29   :  { %531 = vmatpush3.bf16.msra.mxu0 %v571_v1  ;;  %539 = vmatpush3.bf16.msra.mxu1 %v572_v2  ;;  %v509_v7 = vcombine.low %v757_v5, %v759_v6  ;;  %v203_v10 = vunpack.c.l.s4 %v697_v9  ;;  %v770_v13 = vshrl.u32 %v205_v11, 7  ;;  %v516_v28 = vld [vmem:[%s822_s4] ss:$0 sm:$0xff]  ;;  %v269_v42 = vand.u32 127, %v205_v11 }
  0x2a   :  { %532 = vmatprep.subr.bf16.mxu0 %v695_v0  ;;  %540 = vmatprep.subr.bf16.mxu1 %v695_v0  ;;  %v517_v34 = vld [vmem:[%s823_s5] ss:$0 sm:$0xff]  ;;  %vm281_vm3 = vcmask 58368   ;;  %v698_v53 = vmov 0   ;;  %vm372_vm4 = vcmask 1043456   ;;  %vm368_vm5 = vcmask 64512  }
  0x2b   :  { %v204_v12 = vunpack.c.0.s8 %v203_v10  ;;  %v774_v18 = vsub.s32 0, %v770_v13  ;;  %v790_v45 = vsub.s32 %v269_v42, %v770_v13  ;;  %570 = vset.pattern.permute.xlu0 %v698_v53  ;;  %569 = vset.pattern.permute.xlu1 %v698_v53  ;;  %v292_v54 = vsub.s32 1, %v770_v13  ;;  %s699_s5 = smov [#allocation10]  }
  0x2c   :  { %s495_s6 = sshll.u32 %s699_s5, 4  ;;  %s496_s6 = int_to_ptr.vmem [resolvable:$true] %s495_s6 }
  0x2d   :  { %533 = vmatpush3.bf16.msra.mxu0 %v573_v3  ;;  %541 = vmatpush3.bf16.msra.mxu1 %v574_v4  ;;  %v207_v14 = vsub.s32 %v204_v12, %v770_v13  ;;  %s642_s25 = scalar_lea.vmem %s496_s6, 32  ;;  %p647_p2 = scmp.lt.s32.totalorder %s496_s6, %s496_s6 }
  0x2e   :  { %546 = vmatprep.subr.bf16.mxu0 %v695_v0  ;;  %552 = vmatprep.subr.bf16.mxu1 %v695_v0  ;;  %p643_p1 = scmp.ne.s32.totalorder %s496_s6, %s642_s25  ;;  %p648_p3 = scmp.lt.s32.totalorder %s642_s25, %s642_s25 }
  0x30   :  { %535 = vmatmul.mubr.msk.bf16.vlgmr.msra.gmra.mxu0 %vm97_vm1, %v509_v7  ;;  %543 = vmatmul.mubr.msk.bf16.vlgmr.msra.gmra.mxu1 %vm97_vm1, %v75_v8  ;;  %p649_p4 = por %p648_p3, %p647_p2 }
  0x31   :  { %548 = vmatprep.mubr.msk.bf16.mxu0 %vm696_vm0, %v695_v0  ;;  %554 = vmatprep.mubr.msk.bf16.mxu1 %vm696_vm0, %v695_v0 }
  0x32   :  { %p650_p5 = pnand %p649_p4, %p643_p1 }
  0xf0   :  { %v135_v15 = vpop.f32.mrf.mxu0  ;;  %v195_v16 = vpop.f32.mrf.mxu1 }
  0xf1   :  { %v208_v17 = vrot.slane %v195_v16, %v207_v14 }
  0xf2   :  { %v536_v19 = vpop.f32.mrf.mxu0  ;;  %v544_v20 = vpop.f32.mrf.mxu1 }
  0xf3   :  { %v209_v21 = vcombine.high %v208_v17, %v208_v17  ;;  %v216_v22 = vrot.slane %v208_v17, %v207_v14  ;;  %v430_v19 = vsel %vm372_vm4, %v759_v6, 0 }
  0xf4   :  { %v138_v23 = vpop.f32.mrf.mxu0  ;;  %v198_v24 = vpop.f32.mrf.mxu1  ;;  %553 = vmatpush3.bf16.msra.mxu1 %v430_v19 }
  0xf5   :  { %v227_v25 = vrot.slane %v216_v22, %v774_v18  ;;  %v223_v26 = vrot.slane %v209_v21, %v207_v14 }
  0xf6   :  { %v537_v27 = vpop.f32.mrf.mxu0  ;;  %v545_v29 = vpop.f32.mrf.mxu1 }
  0xf7   :  { %v231_v30 = vrot.slane %v223_v26, %v774_v18  ;;  %v234_v31 = vadd.f32 %v227_v25, %v135_v15  ;;  %v374_v15 = vsel %vm372_vm4, %v757_v5, 0 }
  0xf8   :  { %547 = vmatpush3.bf16.msra.mxu0 %v374_v15 }
  0xf9   :  { %v235_v32 = vadd.f32 %v231_v30, %v138_v23  ;;  %v243_v33 = vadd.f32 %v516_v28, %v234_v31 }
  0xfb   :  { %v244_v35 = vadd.f32 %v516_v28, %v235_v32  ;;  %v245_v36 = vmax.f32 %v243_v33, 0.0 }
  0xfd   :  { %v246_v37 = vmax.f32 %v244_v35, 0.0  ;;  %v254_v38 = vmul.f32 %v517_v34, %v245_v36 }
  0xff   :  { %v256_v39 = vsel %vm97_vm1, %v254_v38, 0.0  ;;  %v255_v40 = vmul.f32 %v517_v34, %v246_v37 }
 0x100   :  { %257 = vadd.xlane.f32.xlu0 %v256_v39 }
 0x101   :  { %v259_v41 = vsel %vm97_vm1, %v255_v40, 0.0 }
 0x104   :  { %260 = vadd.xlane.f32.xlu0 %v259_v41 }
 0x189   :  { %v258_v44 = vpop.xlane.xlu0 %257 }
 0x18a   :  { %v264_v46 = vadd.f32 %v263_v43, %v258_v44 }
 0x18c   :  { %v273_v49 = vrot.slane %v264_v46, %v790_v45 }
 0x18d   :  { %v261_v47 = vpop.xlane.xlu0 %260 }
 0x18e   :  { %v265_v48 = vadd.f32 %v263_v43, %v261_v47 }
 0x190   :  { %v277_v50 = vrot.slane %v265_v48, %v790_v45 }
 0x192   :  { %v279_v51 = vsel %vm278_vm2, %v277_v50, %v273_v49 }
 0x193   :  { %v282_v52 = vsel %vm281_vm3, %v279_v51, -inf }
 0x194   :  { %283 = vmax.xlane.f32.xlu1 %v282_v52 }
 0x21d   :  { %v284_v55 = vpop.xlane.xlu1 %283 }
 0x21e   :  { %v289_v56 = vrot.slane %v284_v55, %v774_v18  ;;  %v293_v57 = vrot.slane %v284_v55, %v292_v54 }
 0x220   :  { %v296_v58 = vsub.f32 %v264_v46, %v289_v56  ;;  %v297_v59 = vsub.f32 %v265_v48, %v293_v57 }
 0x222   :  { %v298_v60 = vmul.f32 1.442695, %v296_v58  ;;  %v300_v61 = vmul.f32 1.442695, %v297_v59 }
 0x224   :  { %576 = vpow2.f32 %v298_v60 }
 0x225   :  { %578 = vpow2.f32 %v300_v61 }
 0x231   :  { %v577_v62 = vpop.eup %576 }
 0x232   :  { %v579_v63 = vpop.eup %578  ;;  %305 = vperm.xlu1 %569, %v577_v62  }
 0x233   :  { %308 = vperm.xlu0 %570, %v579_v63  }
 0x2ad   :  { %v306_v0 = vpop.permute.xlu1 %305 }
 0x2ae   :  { %v309_v1 = vpop.permute.xlu0 %308  ;;  %v313_v2 = vrot.slane %v306_v0, %v790_v45 }
 0x2af   :  { %v317_v3 = vrot.slane %v309_v1, %v790_v45 }
 0x2b1   :  { %v318_v4 = vsel %vm278_vm2, %v317_v3, %v313_v2 }
 0x2b2   :  { %v320_v7 = vsel %vm281_vm3, %v318_v4, 0.0 }
 0x2b3   :  { %321 = vadd.xlane.f32.xlu1 %v320_v7 }
 0x33c   :  { %v322_v8 = vpop.xlane.xlu1 %321 }
 0x33d   :  { %580 = vrcp.f32 %v322_v8 }
 0x34a   :  { %v581_v9 = vpop.eup %580 }
 0x34b   :  { %v328_v10 = vrot.slane %v581_v9, %v774_v18  ;;  %v332_v11 = vrot.slane %v581_v9, %v292_v54 }
 0x34d   :  { %v335_v12 = vmul.f32 %v577_v62, %v328_v10  ;;  %v336_v13 = vmul.f32 %v579_v63, %v332_v11 }
 0x34f   :  { %340 = vperm.xlu1 %569, %v335_v12   ;;  %v356_v14 = vpack.c.bf16 %v335_v12, %v335_v12  ;;  %v357_v17 = vpack.c.bf16 %v336_v13, %v336_v13 }
 0x351   :  { %v359_v16 = vunpack.c.l.b16 %v356_v14  ;;  %v417_v20 = vunpack.c.l.b16 %v357_v17 }
 0x353   :  { %361 = vperm.xlu0 %570, %v359_v16  }
 0x357   :  { %419 = vperm.xlu0 %570, %v417_v20  }
 0x35b   :  { %343 = vperm.xlu0 %570, %v336_v13  }
 0x3ca   :  { %v341_v5 = vpop.permute.xlu1 %340 }
 0x3cb   :  { %v348_v27 = vrot.slane %v341_v5, %v790_v45 }
 0x3ce   :  { %v362_v21 = vpop.permute.xlu0 %361 }
 0x3cf   :  { %v366_v18 = vrot.slane %v362_v21, %v790_v45 }
 0x3d1   :  { %v367_v22 = vpack.c.b16 %v366_v18, %v366_v18 }
 0x3d2   :  { %v420_v23 = vpop.permute.xlu0 %419 }
 0x3d3   :  { %v424_v24 = vrot.slane %v420_v23, %v790_v45  ;;  %549 = vmatmul.mubr.msk.bf16.vlgmr.msra.gmra.mxu0 %vm368_vm5, %v367_v22 }
 0x3d5   :  { %v425_v25 = vpack.c.b16 %v424_v24, %v424_v24 }
 0x3d6   :  { %v344_v26 = vpop.permute.xlu0 %343 }
 0x3d7   :  { %v352_v6 = vrot.slane %v344_v26, %v790_v45  ;;  %555 = vmatmul.mubr.msk.bf16.vlgmr.msra.gmra.mxu1 %vm368_vm5, %v425_v25 }
 0x3d9   :  { %v353_v28 = vsel %vm278_vm2, %v352_v6, %v348_v27 }
 0x3da   :  { %355 = vst.msk [vmem:[#allocation10] sm:$0x3] %vm281_vm3, %v353_v28 }
 0x3db   :  { %653 = shalt.err (!%p650_p5)
}
 0x3dc   :  { %498 = dma.vmem_to_hbm [thread:$0]  %s496_s6, 32, %s826_s8, [#allocation11]   ;;  %vm477_vm6 = vcmask 254976  }
 0x3dd   :  { %s700_s28 = smov [#allocation9]  }
 0x3de   :  { %s485_s29 = sshll.u32 %s700_s28, 4  ;;  %s486_s29 = int_to_ptr.vmem [resolvable:$true] %s485_s29 }
 0x3df   :  { %s662_s30 = scalar_lea.vmem %s486_s29, 32  ;;  %p667_p7 = scmp.lt.s32.totalorder %s486_s29, %s486_s29 }
 0x3e0   :  { %p663_p6 = scmp.ne.s32.totalorder %s486_s29, %s662_s30  ;;  %p668_p8 = scmp.lt.s32.totalorder %s662_s30, %s662_s30 }
 0x3e2   :  { %p669_p9 = por %p668_p8, %p667_p7 }
 0x3e4   :  { %p670_p10 = pnand %p669_p9, %p663_p6 }
 0x493   :  { %v410_v29 = vpop.f32.mrf.mxu0 }
 0x495   :  { %v550_v30 = vpop.f32.mrf.mxu0 }
 0x497   :  { %v413_v31 = vpop.f32.mrf.mxu0  ;;  %v466_v32 = vpop.f32.mrf.mxu1 }
 0x498   :  { %v474_v33 = vrot.slane %v466_v32, 7 }
 0x499   :  { %v551_v34 = vpop.f32.mrf.mxu0  ;;  %v556_v35 = vpop.f32.mrf.mxu1 }
 0x49a   :  { %v475_v36 = vsel %vm278_vm2, %v474_v33, %v410_v29 }
 0x49b   :  { %v469_v37 = vpop.f32.mrf.mxu1  ;;  %478 = vst.msk [vmem:[#allocation9] sm:$0x3] %vm477_vm6, %v475_v36 }
 0x49c   :  { %673 = shalt.err (!%p670_p10)
}
 0x49d   :  { %488 = dma.vmem_to_hbm [thread:$0]  %s486_s29, 32, %s825_s7, [#allocation5]   ;;  %v557_v38 = vpop.f32.mrf.mxu1 }
 0x49e   :  { %686 = dma.done.wait [#allocation5], 32  }
 0x49f   :  { %687 = vsyncadd [#allocation5], 4294967264 }
 0x4a0   :  { %688 = dma.done.wait [#allocation11], 32  }
 0x4a1   :  { %689 = vsyncadd [#allocation11], 4294967264 }
 0x4a2   :  { %505 = vsyncpa [#allocation4], 1 }
 0x4a3   :  { %506 = vsyncpa [#allocation7], 1 }
 0x4a4   :  { %507 = vsyncpa [#allocation5], 1 }
 0x4a5   :  { %508 = vsyncpa [#allocation11], 1 }

</bundles_post_ra>
